<compile_context>
chip_gen: v6e
topology: v6e:2x2x1
jax: 0.10.0
libtpu: 0.0.40
codegen_flags: <defaults>
</compile_context>

<pallas_src>
import functools

import jax
import jax.numpy as jnp
from jax import lax
from jax.experimental import pallas as pl
from jax.experimental.pallas import tpu as pltpu


def _round_up(x, m):
    return (x + m - 1) // m * m


# --------------------------- Pallas kernel ---------------------------------

def _conv_kernel(x_ref, w_ref, b_ref, o_ref, *, kh_sz, kw_sz, width, hw_out):
    # x_ref: (1, CP, HWP)      one image, channels padded to 8, flat H*W zero-padded
    # w_ref: (KH*KW, OCP, CP)  w_ref[kh*KW+kw, oc, c] = weight[oc, c, kh, kw]
    # b_ref: (OCP, 1)          bias (broadcast over lanes)
    # o_ref: (1, OCP, HW_OUT)  out[0, oc, ho*W + wo]; columns with wo >= WO or
    #                          ho >= HO are junk and sliced off by the wrapper.
    ocp = o_ref.shape[1]
    acc = jnp.zeros((ocp, hw_out), dtype=jnp.float32)
    # Unrolled at trace time: 9 shifted windows of the flat image, one small
    # MXU dot each; contraction over (padded) input channels.
    for i in range(kh_sz):
        for j in range(kw_sz):
            s = i * width + j                       # flat shift = kh*W + kw
            win = x_ref[0, :, s:s + hw_out]         # (CP, HW_OUT)
            wk = w_ref[i * kw_sz + j]               # (OCP, CP)
            acc = acc + jnp.dot(wk, win, preferred_element_type=jnp.float32)
    o_ref[0] = (acc + b_ref[...]).astype(o_ref.dtype)


# --------------------------- Conv2d wrapper ---------------------------------

def _conv2d_pallas(x, weight, bias):
    N, C, H, W = x.shape
    OC, _, KH, KW = weight.shape
    HO, WO = H - KH + 1, W - KW + 1

    CP = _round_up(C, 8)                 # channels padded to sublane multiple
    OCP = _round_up(OC, 8)               # out-channels padded to sublane multiple
    HW = H * W
    HW_OUT = _round_up(HW, 128)          # lane-dense output width
    max_shift = (KH - 1) * W + (KW - 1)  # largest flat window shift
    HWP = _round_up(HW_OUT + max_shift, 128)

    # Contiguous reshape (free) + a single zero-pad (channels + flat tail).
    x_flat = x.reshape(N, C, HW)
    x_pad = jnp.pad(x_flat, ((0, 0), (0, CP - C), (0, HWP - HW)))

    # w_stack[kh*KW + kw, oc, c] = weight[oc, c, kh, kw]; pad oc->OCP, c->CP.
    w_stack = jnp.transpose(weight, (2, 3, 0, 1)).reshape(KH * KW, OC, C)
    w_pad = jnp.pad(w_stack, ((0, 0), (0, OCP - OC), (0, CP - C)))
    b_pad = jnp.pad(bias, (0, OCP - OC)).reshape(OCP, 1)

    kernel = functools.partial(_conv_kernel, kh_sz=KH, kw_sz=KW, width=W,
                               hw_out=HW_OUT)

    out_pad = pl.pallas_call(
        kernel,
        out_shape=jax.ShapeDtypeStruct((N, OCP, HW_OUT), jnp.float32),
        grid_spec=pltpu.PrefetchScalarGridSpec(
            num_scalar_prefetch=0,
            grid=(N,),
            in_specs=[
                pl.BlockSpec((1, CP, HWP), lambda n: (n, 0, 0)),
                # Constant index maps -> weights/bias DMA'd once, stay resident.
                pl.BlockSpec((KH * KW, OCP, CP), lambda n: (0, 0, 0)),
                pl.BlockSpec((OCP, 1), lambda n: (0, 0)),
            ],
            out_specs=pl.BlockSpec((1, OCP, HW_OUT), lambda n: (n, 0, 0)),
        ),
        compiler_params=pltpu.CompilerParams(
            dimension_semantics=("parallel",)),   # >=2 blocks: both v7x TCs busy
    )(x_pad, w_pad, b_pad)

    # (N, OCP, HW_OUT) -> (N, OC, HO, WO): slice + contiguous reshape, NCHW directly,
    # no transpose needed.
    out = out_pad[:, :OC, :HW].reshape(N, OC, H, W)[:, :, :HO, :WO]
    return out


@jax.jit
def qianshi_forward(x, weight, bias):
    """Conv2d(3->6, k=3, stride=1, padding=0) forward.

    x:      (N, C, H, W)      float32 (NCHW, like PyTorch)
    weight: (OC, C, KH, KW)   float32 (OIHW, like PyTorch)
    bias:   (OC,)             float32
    returns (N, OC, H-2, W-2) float32
    """
    return _conv2d_pallas(x, weight, bias)


# --------------------------- main -------------------------------------------

if __name__ == "__main__":
    key = jax.random.PRNGKey(0)
    k_x, k_w, k_b = jax.random.split(key, 3)

    N, C, H, W = 2, 3, 16, 16
    OC, KH, KW = 6, 3, 3

    x = jax.random.normal(k_x, (N, C, H, W), dtype=jnp.float32)

    # Deterministic parameter init (uniform in +/- 1/sqrt(fan_in), like PyTorch).
    fan_in = C * KH * KW
    bound = 1.0 / (fan_in ** 0.5)
    weight = jax.random.uniform(k_w, (OC, C, KH, KW), jnp.float32, -bound, bound)
    bias = jax.random.uniform(k_b, (OC,), jnp.float32, -bound, bound)

    out = qianshi_forward(x, weight, bias)
    out = jax.block_until_ready(out)

    # Cross-check against XLA's conv for correctness.
    ref = lax.conv_general_dilated(
        x, weight, window_strides=(1, 1), padding="VALID",
        dimension_numbers=("NCHW", "OIHW", "NCHW"),
    ) + bias[None, :, None, None]
    assert out.shape == (N, OC, H - KH + 1, W - KW + 1), out.shape
    assert jnp.allclose(out, ref, atol=1e-4, rtol=1e-4), "mismatch vs reference conv"

    print("KERNEL_OK")
</pallas_src>

<mosaic_0001>
module attributes {stable_mosaic.version = 11 : i64} {
  func.func @_conv_kernel(%arg0: i32, %arg1: memref<1x8x384xf32, #tpu.memory_space<vmem>>, %arg2: memref<9x8x8xf32, #tpu.memory_space<vmem>>, %arg3: memref<8x1xf32, #tpu.memory_space<vmem>>, %arg4: memref<1x8x256xf32, #tpu.memory_space<vmem>>) attributes {dimension_semantics = [#tpu.dimension_semantics<parallel>], iteration_bounds = array<i64: 2>, scalar_prefetch = 0 : i64, scratch_operands = 0 : i64, tpu.core_type = #tpu.core_type<tc>, window_params = [{transform_indices = @transform_0, window_bounds = array<i64: 1, 8, 384>}, {pipeline_mode = #tpu.pipeline_mode<synchronous>, transform_indices = @transform_1, window_bounds = array<i64: 9, 8, 8>}, {pipeline_mode = #tpu.pipeline_mode<synchronous>, transform_indices = @transform_2, window_bounds = array<i64: 8, 1>}, {transform_indices = @transform_3, window_bounds = array<i64: 1, 8, 256>}]} {
    %cst = arith.constant 0.000000e+00 : f32
    %0 = vector.broadcast %cst : f32 to vector<8x256xf32>
    %c0 = arith.constant 0 : index
    %c0_0 = arith.constant 0 : index
    %c0_1 = arith.constant 0 : index
    %1 = vector.load %arg1[%c0, %c0_0, %c0_1] : memref<1x8x384xf32, #tpu.memory_space<vmem>>, vector<1x8x256xf32>
    %2 = vector.shape_cast %1 : vector<1x8x256xf32> to vector<8x256xf32>
    %c0_2 = arith.constant 0 : index
    %c0_3 = arith.constant 0 : index
    %c0_4 = arith.constant 0 : index
    %3 = vector.load %arg2[%c0_2, %c0_3, %c0_4] : memref<9x8x8xf32, #tpu.memory_space<vmem>>, vector<1x8x8xf32>
    %4 = vector.shape_cast %3 : vector<1x8x8xf32> to vector<8x8xf32>
    %cst_5 = arith.constant dense<0.000000e+00> : vector<8x256xf32>
    %5 = tpu.matmul %4, %2, %cst_5 {dimension_numbers = #tpu.dot_dimension_numbers<[1], [0], [0], [1], [0, 0, 1, 1], [], []>} : vector<8x8xf32>, vector<8x256xf32>, vector<8x256xf32> -> vector<8x256xf32>
    %6 = arith.addf %0, %5 : vector<8x256xf32>
    %c0_6 = arith.constant 0 : index
    %c0_7 = arith.constant 0 : index
    %c1 = arith.constant 1 : index
    %7 = vector.load %arg1[%c0_6, %c0_7, %c1] : memref<1x8x384xf32, #tpu.memory_space<vmem>>, vector<1x8x256xf32>
    %8 = vector.shape_cast %7 : vector<1x8x256xf32> to vector<8x256xf32>
    %c1_8 = arith.constant 1 : index
    %c0_9 = arith.constant 0 : index
    %c0_10 = arith.constant 0 : index
    %9 = vector.load %arg2[%c1_8, %c0_9, %c0_10] : memref<9x8x8xf32, #tpu.memory_space<vmem>>, vector<1x8x8xf32>
    %10 = vector.shape_cast %9 : vector<1x8x8xf32> to vector<8x8xf32>
    %cst_11 = arith.constant dense<0.000000e+00> : vector<8x256xf32>
    %11 = tpu.matmul %10, %8, %cst_11 {dimension_numbers = #tpu.dot_dimension_numbers<[1], [0], [0], [1], [0, 0, 1, 1], [], []>} : vector<8x8xf32>, vector<8x256xf32>, vector<8x256xf32> -> vector<8x256xf32>
    %12 = arith.addf %6, %11 : vector<8x256xf32>
    %c0_12 = arith.constant 0 : index
    %c0_13 = arith.constant 0 : index
    %c2 = arith.constant 2 : index
    %13 = vector.load %arg1[%c0_12, %c0_13, %c2] : memref<1x8x384xf32, #tpu.memory_space<vmem>>, vector<1x8x256xf32>
    %14 = vector.shape_cast %13 : vector<1x8x256xf32> to vector<8x256xf32>
    %c2_14 = arith.constant 2 : index
    %c0_15 = arith.constant 0 : index
    %c0_16 = arith.constant 0 : index
    %15 = vector.load %arg2[%c2_14, %c0_15, %c0_16] : memref<9x8x8xf32, #tpu.memory_space<vmem>>, vector<1x8x8xf32>
    %16 = vector.shape_cast %15 : vector<1x8x8xf32> to vector<8x8xf32>
    %cst_17 = arith.constant dense<0.000000e+00> : vector<8x256xf32>
    %17 = tpu.matmul %16, %14, %cst_17 {dimension_numbers = #tpu.dot_dimension_numbers<[1], [0], [0], [1], [0, 0, 1, 1], [], []>} : vector<8x8xf32>, vector<8x256xf32>, vector<8x256xf32> -> vector<8x256xf32>
    %18 = arith.addf %12, %17 : vector<8x256xf32>
    %c0_18 = arith.constant 0 : index
    %c0_19 = arith.constant 0 : index
    %c16 = arith.constant 16 : index
    %19 = vector.load %arg1[%c0_18, %c0_19, %c16] : memref<1x8x384xf32, #tpu.memory_space<vmem>>, vector<1x8x256xf32>
    %20 = vector.shape_cast %19 : vector<1x8x256xf32> to vector<8x256xf32>
    %c3 = arith.constant 3 : index
    %c0_20 = arith.constant 0 : index
    %c0_21 = arith.constant 0 : index
    %21 = vector.load %arg2[%c3, %c0_20, %c0_21] : memref<9x8x8xf32, #tpu.memory_space<vmem>>, vector<1x8x8xf32>
    %22 = vector.shape_cast %21 : vector<1x8x8xf32> to vector<8x8xf32>
    %cst_22 = arith.constant dense<0.000000e+00> : vector<8x256xf32>
    %23 = tpu.matmul %22, %20, %cst_22 {dimension_numbers = #tpu.dot_dimension_numbers<[1], [0], [0], [1], [0, 0, 1, 1], [], []>} : vector<8x8xf32>, vector<8x256xf32>, vector<8x256xf32> -> vector<8x256xf32>
    %24 = arith.addf %18, %23 : vector<8x256xf32>
    %c0_23 = arith.constant 0 : index
    %c0_24 = arith.constant 0 : index
    %c17 = arith.constant 17 : index
    %25 = vector.load %arg1[%c0_23, %c0_24, %c17] : memref<1x8x384xf32, #tpu.memory_space<vmem>>, vector<1x8x256xf32>
    %26 = vector.shape_cast %25 : vector<1x8x256xf32> to vector<8x256xf32>
    %c4 = arith.constant 4 : index
    %c0_25 = arith.constant 0 : index
    %c0_26 = arith.constant 0 : index
    %27 = vector.load %arg2[%c4, %c0_25, %c0_26] : memref<9x8x8xf32, #tpu.memory_space<vmem>>, vector<1x8x8xf32>
    %28 = vector.shape_cast %27 : vector<1x8x8xf32> to vector<8x8xf32>
    %cst_27 = arith.constant dense<0.000000e+00> : vector<8x256xf32>
    %29 = tpu.matmul %28, %26, %cst_27 {dimension_numbers = #tpu.dot_dimension_numbers<[1], [0], [0], [1], [0, 0, 1, 1], [], []>} : vector<8x8xf32>, vector<8x256xf32>, vector<8x256xf32> -> vector<8x256xf32>
    %30 = arith.addf %24, %29 : vector<8x256xf32>
    %c0_28 = arith.constant 0 : index
    %c0_29 = arith.constant 0 : index
    %c18 = arith.constant 18 : index
    %31 = vector.load %arg1[%c0_28, %c0_29, %c18] : memref<1x8x384xf32, #tpu.memory_space<vmem>>, vector<1x8x256xf32>
    %32 = vector.shape_cast %31 : vector<1x8x256xf32> to vector<8x256xf32>
    %c5 = arith.constant 5 : index
    %c0_30 = arith.constant 0 : index
    %c0_31 = arith.constant 0 : index
    %33 = vector.load %arg2[%c5, %c0_30, %c0_31] : memref<9x8x8xf32, #tpu.memory_space<vmem>>, vector<1x8x8xf32>
    %34 = vector.shape_cast %33 : vector<1x8x8xf32> to vector<8x8xf32>
    %cst_32 = arith.constant dense<0.000000e+00> : vector<8x256xf32>
    %35 = tpu.matmul %34, %32, %cst_32 {dimension_numbers = #tpu.dot_dimension_numbers<[1], [0], [0], [1], [0, 0, 1, 1], [], []>} : vector<8x8xf32>, vector<8x256xf32>, vector<8x256xf32> -> vector<8x256xf32>
    %36 = arith.addf %30, %35 : vector<8x256xf32>
    %c0_33 = arith.constant 0 : index
    %c0_34 = arith.constant 0 : index
    %c32 = arith.constant 32 : index
    %37 = vector.load %arg1[%c0_33, %c0_34, %c32] : memref<1x8x384xf32, #tpu.memory_space<vmem>>, vector<1x8x256xf32>
    %38 = vector.shape_cast %37 : vector<1x8x256xf32> to vector<8x256xf32>
    %c6 = arith.constant 6 : index
    %c0_35 = arith.constant 0 : index
    %c0_36 = arith.constant 0 : index
    %39 = vector.load %arg2[%c6, %c0_35, %c0_36] : memref<9x8x8xf32, #tpu.memory_space<vmem>>, vector<1x8x8xf32>
    %40 = vector.shape_cast %39 : vector<1x8x8xf32> to vector<8x8xf32>
    %cst_37 = arith.constant dense<0.000000e+00> : vector<8x256xf32>
    %41 = tpu.matmul %40, %38, %cst_37 {dimension_numbers = #tpu.dot_dimension_numbers<[1], [0], [0], [1], [0, 0, 1, 1], [], []>} : vector<8x8xf32>, vector<8x256xf32>, vector<8x256xf32> -> vector<8x256xf32>
    %42 = arith.addf %36, %41 : vector<8x256xf32>
    %c0_38 = arith.constant 0 : index
    %c0_39 = arith.constant 0 : index
    %c33 = arith.constant 33 : index
    %43 = vector.load %arg1[%c0_38, %c0_39, %c33] : memref<1x8x384xf32, #tpu.memory_space<vmem>>, vector<1x8x256xf32>
    %44 = vector.shape_cast %43 : vector<1x8x256xf32> to vector<8x256xf32>
    %c7 = arith.constant 7 : index
    %c0_40 = arith.constant 0 : index
    %c0_41 = arith.constant 0 : index
    %45 = vector.load %arg2[%c7, %c0_40, %c0_41] : memref<9x8x8xf32, #tpu.memory_space<vmem>>, vector<1x8x8xf32>
    %46 = vector.shape_cast %45 : vector<1x8x8xf32> to vector<8x8xf32>
    %cst_42 = arith.constant dense<0.000000e+00> : vector<8x256xf32>
    %47 = tpu.matmul %46, %44, %cst_42 {dimension_numbers = #tpu.dot_dimension_numbers<[1], [0], [0], [1], [0, 0, 1, 1], [], []>} : vector<8x8xf32>, vector<8x256xf32>, vector<8x256xf32> -> vector<8x256xf32>
    %48 = arith.addf %42, %47 : vector<8x256xf32>
    %c0_43 = arith.constant 0 : index
    %c0_44 = arith.constant 0 : index
    %c34 = arith.constant 34 : index
    %49 = vector.load %arg1[%c0_43, %c0_44, %c34] : memref<1x8x384xf32, #tpu.memory_space<vmem>>, vector<1x8x256xf32>
    %50 = vector.shape_cast %49 : vector<1x8x256xf32> to vector<8x256xf32>
    %c8 = arith.constant 8 : index
    %c0_45 = arith.constant 0 : index
    %c0_46 = arith.constant 0 : index
    %51 = vector.load %arg2[%c8, %c0_45, %c0_46] : memref<9x8x8xf32, #tpu.memory_space<vmem>>, vector<1x8x8xf32>
    %52 = vector.shape_cast %51 : vector<1x8x8xf32> to vector<8x8xf32>
    %cst_47 = arith.constant dense<0.000000e+00> : vector<8x256xf32>
    %53 = tpu.matmul %52, %50, %cst_47 {dimension_numbers = #tpu.dot_dimension_numbers<[1], [0], [0], [1], [0, 0, 1, 1], [], []>} : vector<8x8xf32>, vector<8x256xf32>, vector<8x256xf32> -> vector<8x256xf32>
    %54 = arith.addf %48, %53 : vector<8x256xf32>
    %c0_48 = arith.constant 0 : index
    %c0_49 = arith.constant 0 : index
    %55 = vector.load %arg3[%c0_48, %c0_49] : memref<8x1xf32, #tpu.memory_space<vmem>>, vector<8x1xf32>
    %56 = vector.broadcast %55 : vector<8x1xf32> to vector<8x256xf32>
    %57 = arith.addf %54, %56 : vector<8x256xf32>
    %c0_50 = arith.constant 0 : index
    %c0_51 = arith.constant 0 : index
    %c0_52 = arith.constant 0 : index
    %58 = vector.load %arg4[%c0_50, %c0_51, %c0_52] : memref<1x8x256xf32, #tpu.memory_space<vmem>>, vector<1x8x256xf32>
    %59 = vector.shape_cast %58 : vector<1x8x256xf32> to vector<8x256xf32>
    %60 = vector.shape_cast %57 : vector<8x256xf32> to vector<1x8x256xf32>
    tpu.vector_store %arg4[%c0_50, %c0_51, %c0_52], %60 {strides = array<i32>} : memref<1x8x256xf32, #tpu.memory_space<vmem>>, vector<1x8x256xf32>,
    return
  }
  func.func @transform_0(%arg0: i32) -> (i32, i32, i32) {
    %c0_i32 = arith.constant 0 : i32
    %c0_i32_0 = arith.constant 0 : i32
    %c0_i32_1 = arith.constant 0 : i32
    return %arg0, %c0_i32, %c0_i32_0 : i32, i32, i32
  }
  func.func @transform_1(%arg0: i32) -> (i32, i32, i32) {
    %c0_i32 = arith.constant 0 : i32
    %c0_i32_0 = arith.constant 0 : i32
    %c0_i32_1 = arith.constant 0 : i32
    %c0_i32_2 = arith.constant 0 : i32
    return %c0_i32, %c0_i32_0, %c0_i32_1 : i32, i32, i32
  }
  func.func @transform_2(%arg0: i32) -> (i32, i32) {
    %c0_i32 = arith.constant 0 : i32
    %c0_i32_0 = arith.constant 0 : i32
    %c0_i32_1 = arith.constant 0 : i32
    return %c0_i32, %c0_i32_0 : i32, i32
  }
  func.func @transform_3(%arg0: i32) -> (i32, i32, i32) {
    %c0_i32 = arith.constant 0 : i32
    %c0_i32_0 = arith.constant 0 : i32
    %c0_i32_1 = arith.constant 0 : i32
    return %arg0, %c0_i32, %c0_i32_0 : i32, i32, i32
  }
}

</mosaic_0001>

<bundles_post_ra>
// kernel: qianshi_forward.1
= control target key start
LH: loop header
LB: loop body
LE: loop exit
PB: predicated region body
PF: predicated region fallthrough
CT: control target
= control target key end

     0   :  { %s1116_s12 = smov 0   ;;  %s1185_s0 = inlined_call_operand.vmem [shape: f32[2,8,384], index: 0, kind: input, shape index: {}]   ;;  %s1186_s1 = inlined_call_operand.vmem [shape: f32[9,8,8], index: 1, kind: input, shape index: {}]   ;;  %s1187_s2 = inlined_call_operand.vmem [shape: f32[8,1], index: 2, kind: input, shape index: {}]   ;;  %s1188_s3 = inlined_call_operand.vmem [shape: f32[2,8,256], index: 3, kind: output, shape index: {}]  }
   0x1 LB: > { %s1030_s13 = sadd.s32 4294967295, %s1084_s12   ;;  %p1034_p0 = scmp.ge.s32.totalorder %s1084_s12, 1  ;;  %s1084_s12 = sphi %s1116_s12, %s13_s12  }
   0x2   : > { %p137_p1 = scmp.lt.s32.totalorder %s1084_s12, 3 }
   0x4   : > { %p138_p2 = pnand %p1034_p0, %p137_p1 }
   0x5   : > { %p161_p3 = scmp.lt.s32.totalorder (!%p138_p2), %s1030_s13, 1  ;;  %s1087_s18 = smov (!%p138_p2), 127  }
   0x6   : > { %141 = sbr.rel (%p138_p2) target bundleno = 378 (0x17a), region = 32  ;;  %s1088_s21 = smov (!%p138_p2), 126  }
   0x7   : > { %s1089_s22 = smov (!%p138_p2), 112   ;;  %s1090_s23 = smov (!%p138_p2), 111  }
   0x8   : > { %s1091_s24 = smov (!%p138_p2), 110   ;;  %s1092_s25 = smov (!%p138_p2), 96  }
   0x9   : > { %s1094_s26 = smov (!%p138_p2), 95   ;;  %s1095_s27 = smov (!%p138_p2), 94  }
   0xb   : > { %s1190_s13 = smov (!%p161_p3, %s1030_s13), 1  ;;  %v1086_v0 = vmov 0.0   ;;  %v173_v4 = vld [vmem:[%s1186_s1] sm:$0xff]  ;;  %vm193_vm0 = vcmask 64512   ;;  %v1093_v5 = vmov 0   ;;  %vm188_vm1 = vcmask 1039360  }
   0xc   : > { %s1058_s14 = smul.u32 24, %s1190_s13  ;;  %261 = vmatprep.mubr.f32.mxu0 %v1086_v0  ;;  %335 = vmatprep.mubr.f32.mxu1 %v1086_v0  ;;  %v965_v6 = vld [vmem:[%s1187_s2] sm:$0xff]  ;;  %v1038_v12 = vld [vmem:[%s1186_s1 + $0x8] sm:$0xff]  ;;  %vm350_vm2 = vcmask 1031168   ;;  %v1041_v18 = vld [vmem:[%s1186_s1 + $0x10] sm:$0xff]  ;;  %vm439_vm3 = vcmask 916480  }
   0xd   : > { %1077 = vset.pattern.permute.xlu0 %v1093_v5  ;;  %v1043_v24 = vld [vmem:[%s1186_s1 + $0x18] sm:$0xff]  ;;  %vm528_vm4 = vcmask 908288   ;;  %v1045_v30 = vld [vmem:[%s1186_s1 + $0x20] sm:$0xff]  ;;  %vm617_vm5 = vcmask 900096   ;;  %v1047_v36 = vld [vmem:[%s1186_s1 + $0x28] sm:$0xff]  ;;  %vm706_vm6 = vcmask 785408  }
   0xe   : > { %s165_s17 = scalar_lea.vmem %s1185_s0, %s1058_s14  ;;  %v1049_v42 = vld [vmem:[%s1186_s1 + $0x30] sm:$0xff]  ;;  %vm795_vm7 = vcmask 777216   ;;  %v1051_v48 = vld [vmem:[%s1186_s1 + $0x38] sm:$0xff]  ;;  %vm884_vm8 = vcmask 769024   ;;  %v1053_v54 = vld [vmem:[%s1186_s1 + $0x40] sm:$0xff] }
   0xf   : > { %v175_v1 = vld [vmem:[%s165_s17 + $0x8] sm:$0xff]  ;;  %v174_v2 = vld [vmem:[%s165_s17] sm:$0xff]  ;;  %v176_v3 = vld [vmem:[%s165_s17 + $0x10] sm:$0xff] }
  0x10   : > { %184 = vrot.lane.b32.xlu0 %v175_v1, %s1087_s18  ;;  %182 = vrot.lane.b32.xlu1 %v174_v2, %s1087_s18 }
  0x11   : > { %301 = vmatprep.subr.mxu1 %v175_v1 }
  0x12   : > { %302 = vmatpush1.msra.mxu1 %v174_v2 }
  0x13   : > { %1040 = vmatmul.mubr.msk.f32.vlgmr.msra.gmra.mxu1 %vm193_vm0, %v173_v4 }
  0x14   : > { %186 = vrot.lane.b32.xlu0 %v176_v3, %s1087_s18  ;;  %346 = vrot.lane.b32.xlu1 %v175_v1, %s1088_s21 }
  0x15   : > { %511 = vmatprep.mubr.f32.mxu1 %v1086_v0 }
  0x18   : > { %348 = vrot.lane.b32.xlu0 %v176_v3, %s1088_s21  ;;  %344 = vrot.lane.b32.xlu1 %v174_v2, %s1088_s21  ;;  %s1057_s21 = sshll.u32 %s1190_s13, 4 }
  0x1c   : > { %435 = vrot.lane.b32.xlu0 %v175_v1, %s1089_s22  ;;  %437 = vrot.lane.b32.xlu1 %v176_v3, %s1089_s22 }
  0x20   : > { %433 = vrot.lane.b32.xlu0 %v174_v2, %s1089_s22  ;;  %524 = vrot.lane.b32.xlu1 %v175_v1, %s1090_s23 }
  0x24   : > { %526 = vrot.lane.b32.xlu0 %v176_v3, %s1090_s23  ;;  %522 = vrot.lane.b32.xlu1 %v174_v2, %s1090_s23 }
  0x28   : > { %613 = vrot.lane.b32.xlu0 %v175_v1, %s1091_s24  ;;  %615 = vrot.lane.b32.xlu1 %v176_v3, %s1091_s24 }
  0x2c   : > { %611 = vrot.lane.b32.xlu0 %v174_v2, %s1091_s24  ;;  %702 = vrot.lane.b32.xlu1 %v175_v1, %s1092_s25  ;;  %s170_s24 = scalar_lea.vmem %s1188_s3, %s1057_s21 }
  0x30   : > { %704 = vrot.lane.b32.xlu0 %v176_v3, %s1092_s25  ;;  %700 = vrot.lane.b32.xlu1 %v174_v2, %s1092_s25 }
  0x34   : > { %791 = vrot.lane.b32.xlu0 %v175_v1, %s1094_s26  ;;  %793 = vrot.lane.b32.xlu1 %v176_v3, %s1094_s26 }
  0x38   : > { %789 = vrot.lane.b32.xlu0 %v174_v2, %s1094_s26  ;;  %880 = vrot.lane.b32.xlu1 %v175_v1, %s1095_s27 }
  0x3c   : > { %882 = vrot.lane.b32.xlu0 %v176_v3, %s1095_s27  ;;  %878 = vrot.lane.b32.xlu1 %v174_v2, %s1095_s27 }
  0x40   : > { %968 = vperm.xlu0 %1077, %v965_v6  }
  0x82   : > { %v185_v7 = vpop.permute.xlu0 %184  ;;  %v183_v8 = vpop.permute.xlu1 %182 }
  0x83   : > { %v189_v13 = vsel %vm188_vm1, %v183_v8, %v185_v7 }
  0x86   : > { %v187_v9 = vpop.permute.xlu0 %186  ;;  %v347_v10 = vpop.permute.xlu1 %346 }
  0x87   : > { %v190_v11 = vsel %vm188_vm1, %v185_v7, %v187_v9 }
  0x88   : > { %227 = vmatprep.subr.mxu0 %v190_v11 }
  0x89   : > { %228 = vmatpush1.msra.mxu0 %v189_v13 }
  0x8a   : > { %v349_v14 = vpop.permute.xlu0 %348  ;;  %v345_v15 = vpop.permute.xlu1 %344  ;;  %1039 = vmatmul.mubr.msk.f32.vlgmr.msra.gmra.mxu0 %vm193_vm0, %v1038_v12 }
  0x8b   : > { %v351_v16 = vsel %vm350_vm2, %v345_v15, %v347_v10  ;;  %v352_v17 = vsel %vm350_vm2, %v347_v10, %v349_v14  ;;  %422 = vmatprep.mubr.f32.mxu0 %v1086_v0 }
  0x8c   : > { %388 = vmatprep.subr.mxu0 %v352_v17 }
  0x8d   : > { %389 = vmatpush1.msra.mxu0 %v351_v16 }
  0x8e   : > { %v436_v19 = vpop.permute.xlu0 %435  ;;  %v438_v20 = vpop.permute.xlu1 %437  ;;  %1042 = vmatmul.mubr.msk.f32.vlgmr.msra.gmra.mxu0 %vm193_vm0, %v1041_v18 }
  0x8f   : > { %v441_v21 = vsel %vm439_vm3, %v436_v19, %v438_v20  ;;  %600 = vmatprep.mubr.f32.mxu0 %v1086_v0 }
  0x90   : > { %477 = vmatprep.subr.mxu1 %v441_v21 }
  0x92   : > { %v434_v22 = vpop.permute.xlu0 %433  ;;  %v525_v23 = vpop.permute.xlu1 %524 }
  0x93   : > { %v440_v25 = vsel %vm439_vm3, %v434_v22, %v436_v19 }
  0x94   : > { %478 = vmatpush1.msra.mxu1 %v440_v25 }
  0x95   : > { %1044 = vmatmul.mubr.msk.f32.vlgmr.msra.gmra.mxu1 %vm193_vm0, %v1043_v24 }
  0x96   : > { %v527_v26 = vpop.permute.xlu0 %526  ;;  %v523_v27 = vpop.permute.xlu1 %522  ;;  %689 = vmatprep.mubr.f32.mxu1 %v1086_v0 }
  0x97   : > { %v529_v28 = vsel %vm528_vm4, %v523_v27, %v525_v23  ;;  %v530_v29 = vsel %vm528_vm4, %v525_v23, %v527_v26 }
  0x98   : > { %566 = vmatprep.subr.mxu0 %v530_v29 }
  0x99   : > { %567 = vmatpush1.msra.mxu0 %v529_v28 }
  0x9a   : > { %v614_v31 = vpop.permute.xlu0 %613  ;;  %v616_v32 = vpop.permute.xlu1 %615  ;;  %1046 = vmatmul.mubr.msk.f32.vlgmr.msra.gmra.mxu0 %vm193_vm0, %v1045_v30 }
  0x9b   : > { %v619_v33 = vsel %vm617_vm5, %v614_v31, %v616_v32  ;;  %778 = vmatprep.mubr.f32.mxu0 %v1086_v0 }
  0x9c   : > { %655 = vmatprep.subr.mxu1 %v619_v33 }
  0x9e   : > { %v612_v34 = vpop.permute.xlu0 %611  ;;  %v703_v35 = vpop.permute.xlu1 %702 }
  0x9f   : > { %v618_v37 = vsel %vm617_vm5, %v612_v34, %v614_v31 }
  0xa0   : > { %656 = vmatpush1.msra.mxu1 %v618_v37 }
  0xa1   : > { %1048 = vmatmul.mubr.msk.f32.vlgmr.msra.gmra.mxu1 %vm193_vm0, %v1047_v36 }
  0xa2   : > { %v705_v38 = vpop.permute.xlu0 %704  ;;  %v701_v39 = vpop.permute.xlu1 %700  ;;  %867 = vmatprep.mubr.f32.mxu1 %v1086_v0 }
  0xa3   : > { %v707_v40 = vsel %vm706_vm6, %v701_v39, %v703_v35  ;;  %v708_v41 = vsel %vm706_vm6, %v703_v35, %v705_v38 }
  0xa4   : > { %744 = vmatprep.subr.mxu0 %v708_v41 }
  0xa5   : > { %745 = vmatpush1.msra.mxu0 %v707_v40 }
  0xa6   : > { %v792_v43 = vpop.permute.xlu0 %791  ;;  %v794_v44 = vpop.permute.xlu1 %793  ;;  %1050 = vmatmul.mubr.msk.f32.vlgmr.msra.gmra.mxu0 %vm193_vm0, %v1049_v42 }
  0xa7   : > { %v797_v45 = vsel %vm795_vm7, %v792_v43, %v794_v44  ;;  %956 = vmatprep.mubr.f32.mxu0 %v1086_v0 }
  0xa8   : > { %833 = vmatprep.subr.mxu1 %v797_v45 }
  0xaa   : > { %v790_v46 = vpop.permute.xlu0 %789  ;;  %v881_v47 = vpop.permute.xlu1 %880 }
  0xab   : > { %v796_v49 = vsel %vm795_vm7, %v790_v46, %v792_v43 }
  0xac   : > { %834 = vmatpush1.msra.mxu1 %v796_v49 }
  0xad   : > { %1052 = vmatmul.mubr.msk.f32.vlgmr.msra.gmra.mxu1 %vm193_vm0, %v1051_v48 }
  0xae   : > { %v883_v50 = vpop.permute.xlu0 %882  ;;  %v879_v51 = vpop.permute.xlu1 %878 }
  0xaf   : > { %v885_v52 = vsel %vm884_vm8, %v879_v51, %v881_v47  ;;  %v886_v53 = vsel %vm884_vm8, %v881_v47, %v883_v50 }
  0xb0   : > { %922 = vmatprep.subr.mxu0 %v886_v53 }
  0xb1   : > { %923 = vmatpush1.msra.mxu0 %v885_v52 }
  0xb2   : > { %1054 = vmatmul.mubr.msk.f32.vlgmr.msra.gmra.mxu0 %vm193_vm0, %v1053_v54 }
  0xbb   : > { %v969_v21 = vpop.permute.xlu0 %968 }
  0xd3   : > { %v337_v57 = vpop.f32.mrf.mxu1 }
  0xd5   : > { %v339_v58 = vpop.f32.mrf.mxu1 }
 0x14a   : > { %v263_v55 = vpop.f32.mrf.mxu0 }
 0x14b   : > { %v338_v60 = vadd.f32 %v337_v57, %v263_v55 }
 0x14c   : > { %v265_v56 = vpop.f32.mrf.mxu0 }
 0x14d   : > { %v340_v61 = vadd.f32 %v339_v58, %v265_v56 }
 0x14e   : > { %v424_v59 = vpop.f32.mrf.mxu0 }
 0x14f   : > { %v429_v0 = vadd.f32 %v424_v59, %v338_v60 }
 0x150   : > { %v426_v62 = vpop.f32.mrf.mxu0 }
 0x151   : > { %v430_v1 = vadd.f32 %v426_v62, %v340_v61 }
 0x155   : > { %v513_v63 = vpop.f32.mrf.mxu1 }
 0x156   : > { %v518_v4 = vadd.f32 %v513_v63, %v429_v0 }
 0x157   : > { %v515_v2 = vpop.f32.mrf.mxu1 }
 0x158   : > { %v519_v5 = vadd.f32 %v515_v2, %v430_v1 }
 0x15a   : > { %v602_v3 = vpop.f32.mrf.mxu0 }
 0x15b   : > { %v607_v8 = vadd.f32 %v602_v3, %v518_v4 }
 0x15c   : > { %v604_v6 = vpop.f32.mrf.mxu0 }
 0x15d   : > { %v608_v9 = vadd.f32 %v604_v6, %v519_v5 }
 0x161   : > { %v691_v7 = vpop.f32.mrf.mxu1 }
 0x162   : > { %v696_v12 = vadd.f32 %v691_v7, %v607_v8 }
 0x163   : > { %v693_v10 = vpop.f32.mrf.mxu1 }
 0x164   : > { %v697_v13 = vadd.f32 %v693_v10, %v608_v9 }
 0x166   : > { %v780_v11 = vpop.f32.mrf.mxu0 }
 0x167   : > { %v785_v15 = vadd.f32 %v780_v11, %v696_v12 }
 0x168   : > { %v782_v14 = vpop.f32.mrf.mxu0 }
 0x169   : > { %v786_v17 = vadd.f32 %v782_v14, %v697_v13 }
 0x16d   : > { %v869_v16 = vpop.f32.mrf.mxu1 }
 0x16e   : > { %v874_v19 = vadd.f32 %v869_v16, %v785_v15 }
 0x16f   : > { %v871_v18 = vpop.f32.mrf.mxu1 }
 0x170   : > { %v875_v22 = vadd.f32 %v871_v18, %v786_v17 }
 0x172   : > { %v958_v20 = vpop.f32.mrf.mxu0 }
 0x173   : > { %v963_v23 = vadd.f32 %v958_v20, %v874_v19 }
 0x174   : > { %v960_v24 = vpop.f32.mrf.mxu0 }
 0x175   : > { %v964_v25 = vadd.f32 %v960_v24, %v875_v22  ;;  %v971_v26 = vadd.f32 %v969_v21, %v963_v23 }
 0x177   : > { %v972_v27 = vadd.f32 %v969_v21, %v964_v25  ;;  %973 = vst [vmem:[%s170_s24] sm:$0xff] %v971_v26 }
 0x179   : > { %974 = vst [vmem:[%s170_s24 + $0x8] sm:$0xff] %v972_v27 }
 0x17a PF: > { %s13_s12 = sadd.s32 1, %s1084_s12  }
 0x17b   : > { %p10_p4 = scmp.ge.s32.totalorder %s13_s12, 4  }
 0x17d   :  { %12 = sbr.rel (!%p10_p4) target bundleno = 1 (0x1), region = 70 }

</bundles_post_ra>
